<compile_context>
chip_gen: v7x
topology: tpu7x:2x2x1
jax: 0.10.0
libtpu: 0.0.40
codegen_flags: <defaults>
</compile_context>

<pallas_src>
import jax
import jax.numpy as jnp
from jax.experimental import pallas as pl
from jax.experimental.pallas import tpu as pltpu

LANES = 128                 # TPU lane width
P_ROWS = 3 * LANES + 16     # 3 weight row-blocks + one 16-row bias tile = 400
P_COLS = 2 * LANES          # 256 lanes (fused mu|log_var needs 256)


# ----------------------------------------------------------------------------
# Kernel (closure over the single static lane offset it needs)
# ----------------------------------------------------------------------------
def _make_kernel(ls_off):
    # ls_off = start_dim + end_dim: lane where ls starts in both the input slab
    # (eps) and the output slab (sample).

    def kernel(data_ref, p_ref, out_ref):
        # data_ref: (TB, 128) f32: lanes [0,S)=x, [S+E, S+E+L)=eps, rest 0
        # p_ref   : (400, 256) bf16 packed parameter slab
        # out_ref : (TB, 128) f32: [0,S)=rec, [S,S+E)=preds, [S+E,S+E+L)=ls
        data = data_ref[...]

        # Tile-aligned weight views (row offsets multiples of 16, cols of 128).
        w_enc1 = p_ref[0:LANES, 0:LANES]                 # enc1
        w_c1 = p_ref[0:LANES, LANES:2 * LANES]           # [dec1 | branch1]
        w_mulv = p_ref[LANES:2 * LANES, :]               # fused [mu | log_var]
        w_c2 = p_ref[2 * LANES:3 * LANES, 0:LANES]       # blockdiag(dec2, br2)
        biases = p_ref[3 * LANES:P_ROWS, :].astype(jnp.float32)   # (16, 256)
        b_enc1 = biases[0:1, 0:LANES]
        b_mulv = biases[1:2, :]
        b_c1 = biases[2:3, 0:LANES]
        b_c2 = biases[3:4, 0:LANES]

        # enc1 + relu.  Zero-padded weight rows >= start_dim kill the eps lanes.
        h = jnp.maximum(
            jnp.dot(data.astype(jnp.bfloat16), w_enc1,
                    preferred_element_type=jnp.float32) + b_enc1, 0.0)

        # Fused mu|log_var: one (128,256) matmul, split at the lane-128 tile
        # boundary (zero-cost).  Columns were packed so mu/log_var land at
        # lanes [ls_off, ls_off+latent) — exactly where eps sits in `data`.
        mulv = jnp.dot(h.astype(jnp.bfloat16), w_mulv,
                       preferred_element_type=jnp.float32) + b_mulv
        mu = mulv[:, 0:LANES]
        log_var = mulv[:, LANES:2 * LANES]

        # Reparameterize: no roll/mask needed — mu/log_var are already aligned
        # with eps.  Lanes outside [ls_off, ls_off+latent) have mu=log_var=0,
        # so ls is x-junk at [0,S) (killed later) and 0 elsewhere.
        ls = mu + data * jnp.exp(log_var * 0.5)

        # relu([dec1 | branch1](ls)); weight rows outside the ls lanes are 0.
        g = jnp.maximum(
            jnp.dot(ls.astype(jnp.bfloat16), w_c1,
                    preferred_element_type=jnp.float32) + b_c1, 0.0)

        # blockdiag(dec2, branch2) -> [rec_logits | pred_logits | 0]
        z = jnp.dot(g.astype(jnp.bfloat16), w_c2,
                    preferred_element_type=jnp.float32) + b_c2

        # sigmoid via a single EUP tanh
        sig = 0.5 + 0.5 * jnp.tanh(0.5 * z)

        # Pack [rec | preds | ls | zeros] lane-dense in one store.
        lane = jax.lax.broadcasted_iota(jnp.int32, sig.shape, 1)
        out_ref[...] = jnp.where(lane < ls_off, sig, ls)

    return kernel


# ----------------------------------------------------------------------------
# Host-side one-time parameter packing  ->  (400, 256) bf16 slab
# ----------------------------------------------------------------------------
def pack_params(params, *, latent_dim):
    (w_enc1, b_enc1, w_enc2, b_enc2,
     w_dec1, b_dec1, w_dec2, b_dec2,
     w_br1, b_br1, w_br2, b_br2) = params

    start_dim, ae = w_enc1.shape
    br = w_br1.shape[1]
    end_dim = w_br2.shape[1]
    ls_off = start_dim + end_dim

    # Packed fast path assumes every feature group fits in one 128-lane vreg.
    assert ae <= LANES and ae + br <= LANES
    assert ls_off + latent_dim <= LANES
    assert start_dim <= LANES and latent_dim <= LANES
    # TODO(synk): feature dims beyond these bounds need a K/N-tiled variant.

    slab = jnp.zeros((P_ROWS, P_COLS), jnp.float32)

    # Block A rows [0,128): lanes [0,128)=enc1, lanes [128,256)=[dec1|branch1]
    slab = slab.at[:start_dim, :ae].set(w_enc1)
    slab = slab.at[ls_off:ls_off + latent_dim, LANES:LANES + ae].set(w_dec1)
    slab = slab.at[ls_off:ls_off + latent_dim,
                   LANES + ae:LANES + ae + br].set(w_br1)

    # Block B rows [128,256): fused [mu | log_var]; output columns shifted to
    # ls_off so they line up with eps in the data slab (no in-kernel roll).
    w_mu, w_lv = w_enc2[:, :latent_dim], w_enc2[:, latent_dim:]
    slab = slab.at[LANES:LANES + ae, ls_off:ls_off + latent_dim].set(w_mu)
    slab = slab.at[LANES:LANES + ae,
                   LANES + ls_off:LANES + ls_off + latent_dim].set(w_lv)

    # Block C rows [256,384): block-diagonal(dec2, branch2)
    r0 = 2 * LANES
    slab = slab.at[r0:r0 + ae, :start_dim].set(w_dec2)
    slab = slab.at[r0 + ae:r0 + ae + br,
                   start_dim:start_dim + end_dim].set(w_br2)

    # Bias tile rows [384, 400)
    rb = 3 * LANES
    slab = slab.at[rb, :ae].set(b_enc1)
    slab = slab.at[rb + 1, ls_off:ls_off + latent_dim].set(b_enc2[:latent_dim])
    slab = slab.at[rb + 1,
                   LANES + ls_off:LANES + ls_off + latent_dim].set(b_enc2[latent_dim:])
    slab = slab.at[rb + 2, :ae].set(b_dec1)
    slab = slab.at[rb + 2, ae:ae + br].set(b_br1)
    slab = slab.at[rb + 3, :start_dim].set(b_dec2)
    slab = slab.at[rb + 3, start_dim:start_dim + end_dim].set(b_br2)

    return slab.astype(jnp.bfloat16)


# ----------------------------------------------------------------------------
# Forward wrapper
# ----------------------------------------------------------------------------
def lin_calico_forward(x, eps, param_slab, *, latent_dim, start_dim, end_dim):
    B = x.shape[0]
    ls_off = start_dim + end_dim

    # Batch tiling: >=2 grid steps once B >= 16 (keeps both v7x TCs busy via
    # the "parallel" grid axis), tiles up to 1024 rows for large B (per-step
    # overhead amortization / HBM roofline).
    if B < 16:
        block_b = 8
    elif B <= 2 * 1024:
        block_b = (((B + 1) // 2) + 7) // 8 * 8
    else:
        block_b = 1024
    Bp = -(-B // block_b) * block_b

    # Single (Bp, 128) f32 input slab: x at lanes [0, S), eps at lanes
    # [S+E, S+E+L).  One concatenate + one pad.
    data = jnp.concatenate(
        [x.astype(jnp.float32),
         jnp.zeros((B, ls_off - start_dim), jnp.float32),
         eps.astype(jnp.float32)], axis=1)
    data = jnp.pad(data, ((0, Bp - B), (0, LANES - ls_off - latent_dim)))

    out = pl.pallas_call(
        _make_kernel(ls_off),
        out_shape=jax.ShapeDtypeStruct((Bp, LANES), jnp.float32),
        grid=(Bp // block_b,),
        in_specs=[
            pl.BlockSpec((block_b, LANES), lambda i: (i, 0)),
            pl.BlockSpec((P_ROWS, P_COLS), lambda i: (0, 0)),  # weights resident
        ],
        out_specs=pl.BlockSpec((block_b, LANES), lambda i: (i, 0)),
        compiler_params=pltpu.CompilerParams(
            dimension_semantics=("parallel",),
            vmem_limit_bytes=32 * 1024 * 1024),
        cost_estimate=pl.CostEstimate(
            flops=2 * Bp * LANES * LANES * 5,          # 4 dots, one 256 wide
            transcendentals=2 * Bp * LANES,            # exp + tanh
            bytes_accessed=4 * Bp * LANES * 2 + 2 * P_ROWS * P_COLS,
        ),
    )(data, param_slab)

    # One contiguous slice of the packed output, then split.
    packed = out[:B, :ls_off + latent_dim]
    reconstruction = packed[:, :start_dim]
    preds = packed[:, start_dim:ls_off]
    ls = packed[:, ls_off:]
    return ls, reconstruction, preds


# ----------------------------------------------------------------------------
# Init + pure-JAX reference
# ----------------------------------------------------------------------------
def init_params(key, start_dim, ae_layer, latent_dim, branch_layer, end_dim):
    dims = [
        (start_dim, ae_layer),        # enc1
        (ae_layer, latent_dim * 2),   # enc2
        (latent_dim, ae_layer),       # dec1
        (ae_layer, start_dim),        # dec2
        (latent_dim, branch_layer),   # branch1
        (branch_layer, end_dim),      # branch2
    ]
    params = []
    keys = jax.random.split(key, 2 * len(dims))
    for i, (din, dout) in enumerate(dims):
        bound = 1.0 / (din ** 0.5)
        w = jax.random.uniform(keys[2 * i], (din, dout), jnp.float32, -bound, bound)
        b = jax.random.uniform(keys[2 * i + 1], (dout,), jnp.float32, -bound, bound)
        params += [w, b]
    return tuple(params)


def reference(x, eps, params, latent_dim):
    (w1, b1, w2, b2, wd1, bd1, wd2, bd2, wb1, bb1, wb2, bb2) = params
    dot = lambda a, b: jnp.dot(a, b, precision=jax.lax.Precision.HIGHEST)
    h = jax.nn.relu(dot(x, w1) + b1)
    z = dot(h, w2) + b2
    mu, lv = z[:, :latent_dim], z[:, latent_dim:]
    ls = mu + eps * jnp.exp(lv * 0.5)
    rec = jax.nn.sigmoid(dot(jax.nn.relu(dot(ls, wd1) + bd1), wd2) + bd2)
    preds = jax.nn.sigmoid(dot(jax.nn.relu(dot(ls, wb1) + bb1), wb2) + bb2)
    return ls, rec, preds


if __name__ == "__main__":
    B = 8
    start_dim = 32
    ae_layer = 32
    latent_dim = 16
    branch_layer = 32
    end_dim = 16

    key = jax.random.PRNGKey(0)
    k_x, k_eps, k_p = jax.random.split(key, 3)

    x = jax.random.normal(k_x, (B, start_dim), jnp.float32)
    # epsilon ~ N(0,1): explicit input, plays the role of torch.randn_like(std)
    eps = jax.random.normal(k_eps, (B, latent_dim), jnp.float32)
    params = init_params(k_p, start_dim, ae_layer, latent_dim, branch_layer, end_dim)

    # One-time host-side weight packing (done once per model, reused every call).
    param_slab = pack_params(params, latent_dim=latent_dim)

    fwd = jax.jit(lin_calico_forward,
                  static_argnames=("latent_dim", "start_dim", "end_dim"))
    ls, reconstruction, preds = fwd(x, eps, param_slab,
                                    latent_dim=latent_dim,
                                    start_dim=start_dim,
                                    end_dim=end_dim)
    jax.block_until_ready((ls, reconstruction, preds))

    assert ls.shape == (B, latent_dim)
    assert reconstruction.shape == (B, start_dim)
    assert preds.shape == (B, end_dim)

    # Correctness vs pure-JAX f32 reference (tolerance covers the intentional
    # bf16-weight / bf16-dot-input MXU path vs Precision.HIGHEST f32).
    ls_r, rec_r, preds_r = reference(x, eps, params, latent_dim)
    assert float(jnp.max(jnp.abs(ls - ls_r))) < 5e-2
    assert float(jnp.max(jnp.abs(reconstruction - rec_r))) < 5e-2
    assert float(jnp.max(jnp.abs(preds - preds_r))) < 5e-2
    assert bool(jnp.all(jnp.isfinite(reconstruction)))
    assert bool(jnp.all(jnp.isfinite(preds)))

    print("KERNEL_OK")
</pallas_src>

<mosaic_0001>
module attributes {stable_mosaic.version = 11 : i64} {
  func.func @kernel(%arg0: i32, %arg1: memref<8x128xf32, #tpu.memory_space<vmem>>, %arg2: memref<400x256xbf16, #tpu.memory_space<vmem>>, %arg3: memref<8x128xf32, #tpu.memory_space<vmem>>) attributes {dimension_semantics = [#tpu.dimension_semantics<parallel>], iteration_bounds = array<i64: 1>, scalar_prefetch = 0 : i64, scratch_operands = 0 : i64, tpu.core_type = #tpu.core_type<tc>, window_params = [{transform_indices = @transform_0, window_bounds = array<i64: 8, 128>}, {pipeline_mode = #tpu.pipeline_mode<synchronous>, transform_indices = @transform_1, window_bounds = array<i64: 400, 256>}, {transform_indices = @transform_2, window_bounds = array<i64: 8, 128>}]} {
    %c0 = arith.constant 0 : index
    %c0_0 = arith.constant 0 : index
    %0 = vector.load %arg1[%c0, %c0_0] : memref<8x128xf32, #tpu.memory_space<vmem>>, vector<8x128xf32>
    %c0_1 = arith.constant 0 : index
    %c0_2 = arith.constant 0 : index
    %1 = vector.load %arg2[%c0_1, %c0_2] : memref<400x256xbf16, #tpu.memory_space<vmem>>, vector<128x128xbf16>
    %c0_3 = arith.constant 0 : index
    %c128 = arith.constant 128 : index
    %2 = vector.load %arg2[%c0_3, %c128] : memref<400x256xbf16, #tpu.memory_space<vmem>>, vector<128x128xbf16>
    %c128_4 = arith.constant 128 : index
    %c0_5 = arith.constant 0 : index
    %3 = vector.load %arg2[%c128_4, %c0_5] : memref<400x256xbf16, #tpu.memory_space<vmem>>, vector<128x256xbf16>
    %c256 = arith.constant 256 : index
    %c0_6 = arith.constant 0 : index
    %4 = vector.load %arg2[%c256, %c0_6] : memref<400x256xbf16, #tpu.memory_space<vmem>>, vector<128x128xbf16>
    %c384 = arith.constant 384 : index
    %c0_7 = arith.constant 0 : index
    %5 = vector.load %arg2[%c384, %c0_7] : memref<400x256xbf16, #tpu.memory_space<vmem>>, vector<16x256xbf16>
    %6 = arith.extf %5 : vector<16x256xbf16> to vector<16x256xf32>
    %7 = vector.extract_strided_slice %6 {offsets = [0, 0], sizes = [1, 128], strides = [1, 1]} : vector<16x256xf32> to vector<1x128xf32>
    %8 = vector.extract_strided_slice %6 {offsets = [1, 0], sizes = [1, 256], strides = [1, 1]} : vector<16x256xf32> to vector<1x256xf32>
    %9 = vector.extract_strided_slice %6 {offsets = [2, 0], sizes = [1, 128], strides = [1, 1]} : vector<16x256xf32> to vector<1x128xf32>
    %10 = vector.extract_strided_slice %6 {offsets = [3, 0], sizes = [1, 128], strides = [1, 1]} : vector<16x256xf32> to vector<1x128xf32>
    %11 = arith.truncf %0 : vector<8x128xf32> to vector<8x128xbf16>
    %cst = arith.constant dense<0.000000e+00> : vector<8x128xf32>
    %12 = tpu.matmul %11, %1, %cst {dimension_numbers = #tpu.dot_dimension_numbers<[1], [0], [0], [1], [0, 0, 1, 1], [], []>} : vector<8x128xbf16>, vector<128x128xbf16>, vector<8x128xf32> -> vector<8x128xf32>
    %13 = vector.broadcast %7 : vector<1x128xf32> to vector<8x128xf32>
    %14 = arith.addf %12, %13 : vector<8x128xf32>
    %cst_8 = arith.constant 0.000000e+00 : f32
    %15 = vector.broadcast %cst_8 : f32 to vector<8x128xf32>
    %16 = arith.maximumf %14, %15 : vector<8x128xf32>
    %17 = arith.truncf %16 : vector<8x128xf32> to vector<8x128xbf16>
    %cst_9 = arith.constant dense<0.000000e+00> : vector<8x256xf32>
    %18 = tpu.matmul %17, %3, %cst_9 {dimension_numbers = #tpu.dot_dimension_numbers<[1], [0], [0], [1], [0, 0, 1, 1], [], []>} : vector<8x128xbf16>, vector<128x256xbf16>, vector<8x256xf32> -> vector<8x256xf32>
    %19 = vector.broadcast %8 : vector<1x256xf32> to vector<8x256xf32>
    %20 = arith.addf %18, %19 : vector<8x256xf32>
    %21 = vector.extract_strided_slice %20 {offsets = [0, 0], sizes = [8, 128], strides = [1, 1]} : vector<8x256xf32> to vector<8x128xf32>
    %22 = vector.extract_strided_slice %20 {offsets = [0, 128], sizes = [8, 128], strides = [1, 1]} : vector<8x256xf32> to vector<8x128xf32>
    %cst_10 = arith.constant 5.000000e-01 : f32
    %23 = vector.broadcast %cst_10 : f32 to vector<8x128xf32>
    %24 = arith.mulf %22, %23 : vector<8x128xf32>
    %25 = math.exp %24 : vector<8x128xf32>
    %26 = arith.mulf %0, %25 : vector<8x128xf32>
    %27 = arith.addf %21, %26 : vector<8x128xf32>
    %28 = arith.truncf %27 : vector<8x128xf32> to vector<8x128xbf16>
    %cst_11 = arith.constant dense<0.000000e+00> : vector<8x128xf32>
    %29 = tpu.matmul %28, %2, %cst_11 {dimension_numbers = #tpu.dot_dimension_numbers<[1], [0], [0], [1], [0, 0, 1, 1], [], []>} : vector<8x128xbf16>, vector<128x128xbf16>, vector<8x128xf32> -> vector<8x128xf32>
    %30 = vector.broadcast %9 : vector<1x128xf32> to vector<8x128xf32>
    %31 = arith.addf %29, %30 : vector<8x128xf32>
    %cst_12 = arith.constant 0.000000e+00 : f32
    %32 = vector.broadcast %cst_12 : f32 to vector<8x128xf32>
    %33 = arith.maximumf %31, %32 : vector<8x128xf32>
    %34 = arith.truncf %33 : vector<8x128xf32> to vector<8x128xbf16>
    %cst_13 = arith.constant dense<0.000000e+00> : vector<8x128xf32>
    %35 = tpu.matmul %34, %4, %cst_13 {dimension_numbers = #tpu.dot_dimension_numbers<[1], [0], [0], [1], [0, 0, 1, 1], [], []>} : vector<8x128xbf16>, vector<128x128xbf16>, vector<8x128xf32> -> vector<8x128xf32>
    %36 = vector.broadcast %10 : vector<1x128xf32> to vector<8x128xf32>
    %37 = arith.addf %35, %36 : vector<8x128xf32>
    %cst_14 = arith.constant 5.000000e-01 : f32
    %38 = vector.broadcast %cst_14 : f32 to vector<8x128xf32>
    %39 = arith.mulf %38, %37 : vector<8x128xf32>
    %40 = math.tanh %39 : vector<8x128xf32>
    %cst_15 = arith.constant 5.000000e-01 : f32
    %41 = vector.broadcast %cst_15 : f32 to vector<8x128xf32>
    %42 = arith.mulf %41, %40 : vector<8x128xf32>
    %cst_16 = arith.constant 5.000000e-01 : f32
    %43 = vector.broadcast %cst_16 : f32 to vector<8x128xf32>
    %44 = arith.addf %43, %42 : vector<8x128xf32>
    %45 = tpu.iota {dimensions = array<i32: 1>} : vector<8x128xi32>
    %c48_i32 = arith.constant 48 : i32
    %46 = vector.broadcast %c48_i32 : i32 to vector<8x128xi32>
    %47 = arith.cmpi slt, %45, %46 : vector<8x128xi32>
    %48 = arith.select %47, %44, %27 : vector<8x128xi1>, vector<8x128xf32>
    %c0_17 = arith.constant 0 : index
    %c0_18 = arith.constant 0 : index
    %49 = vector.load %arg3[%c0_17, %c0_18] : memref<8x128xf32, #tpu.memory_space<vmem>>, vector<8x128xf32>
    tpu.vector_store %arg3[%c0_17, %c0_18], %48 {strides = array<i32>} : memref<8x128xf32, #tpu.memory_space<vmem>>, vector<8x128xf32>,
    return
  }
  func.func @transform_0(%arg0: i32) -> (i32, i32) {
    %c0_i32 = arith.constant 0 : i32
    %c0_i32_0 = arith.constant 0 : i32
    return %arg0, %c0_i32 : i32, i32
  }
  func.func @transform_1(%arg0: i32) -> (i32, i32) {
    %c0_i32 = arith.constant 0 : i32
    %c0_i32_0 = arith.constant 0 : i32
    %c0_i32_1 = arith.constant 0 : i32
    return %c0_i32, %c0_i32_0 : i32, i32
  }
  func.func @transform_2(%arg0: i32) -> (i32, i32) {
    %c0_i32 = arith.constant 0 : i32
    %c0_i32_0 = arith.constant 0 : i32
    return %arg0, %c0_i32 : i32, i32
  }
}

</mosaic_0001>

<bundles_post_ra>
// kernel: lin_calico_forward.1
= control target key start
LH: loop header
LB: loop body
LE: loop exit
PB: predicated region body
PF: predicated region fallthrough
CT: control target
= control target key end

     0   :  { %7 = vsyncpa [#allocation3], 0  ;;  %s733_s9 = smov [#allocation2]   ;;  %s821_s0 = inlined_call_operand.vmem [shape: f32[8,128], index: 0, kind: input, shape index: {}]   ;;  %s822_s1 = inlined_call_operand.hbm [shape: bf16[400,256], index: 1, kind: input, shape index: {}]   ;;  %s823_s2 = inlined_call_operand.vmem [shape: f32[8,128], index: 2, kind: output, shape index: {}]  }
   0x1   :  { %s15_s10 = sshll.u32 %s733_s9, 4  ;;  %s709_s13 = scalar_lea.hbm %s822_s1, 6400  ;;  %s16_s10 = int_to_ptr.vmem [resolvable:$true] %s15_s10 }
   0x2   :  { %p710_p0 = scmp.ne.s32.totalorder %s822_s1, %s709_s13  ;;  %p713_p1 = scmp.lt.u32.totalorder %s709_s13, %s822_s1 }
   0x4   :  { %p715_p2 = pnand %p713_p1, %p710_p0 }
   0x6   :  { %718 = shalt.err (!%p715_p2)
}
   0x7   :  { %s719_s18 = scalar_lea.vmem %s16_s10, 6400  ;;  %p724_p4 = scmp.lt.s32.totalorder %s16_s10, %s16_s10 }
   0x8   :  { %p720_p3 = scmp.ne.s32.totalorder %s16_s10, %s719_s18  ;;  %p725_p5 = scmp.lt.s32.totalorder %s719_s18, %s719_s18 }
   0xa   :  { %p726_p6 = por %p725_p5, %p724_p4 }
   0xc   :  { %p727_p7 = pnand %p726_p6, %p720_p3 }
   0xe   :  { %730 = shalt.err (!%p727_p7)
}
   0xf   :  { %s734_s19 = smov 128   ;;  %s735_s20 = smov 8  }
  0x10   :  { %21 = dma.hbm_to_vmem [thread:$0]  %s822_s1, 6400, %s16_s10, [#allocation3], %s734_s19, %s734_s19, %s735_s20  }
  0x11   :  { %731 = dma.done.wait [#allocation3], 6400  }
  0x12   :  { %732 = vsyncadd [#allocation3], 4294960896  ;;  %v736_v0 = vmov 0.0   ;;  %vm737_vm0 = vmmov 0   ;;  %v657_v1 = vld [vmem:[#allocation2] ss:$8 sps:$4 sm:$0xff]   ;;  %v95_v30 = vlaneseq }
  0x13   :  { %591 = vmatprep.subr.bf16.mxu0 %v736_v0  ;;  %607 = vmatprep.mubr.msk.bf16.mxu0 %vm737_vm0, %v736_v0  ;;  %v658_v2 = vld [vmem:[#allocation2 + $0x10] ss:$8 sps:$4 sm:$0xff]   ;;  %v659_v3 = vld [vmem:[#allocation2 + $0x20] ss:$8 sps:$4 sm:$0xff]   ;;  %v665_v4 = vld [vmem:[#allocation2 + $0x84] ss:$8 sps:$4 sm:$0xff]  }
  0x14   :  { %592 = vmatpush3.bf16.msra.mxu0 %v657_v1  ;;  %v667_v5 = vld [vmem:[#allocation2 + $0x80] ss:$8 sps:$4 sm:$0xff]   ;;  %v660_v6 = vld [vmem:[#allocation2 + $0x30] ss:$8 sps:$4 sm:$0xff]   ;;  %v668_v7 = vld [vmem:[#allocation2 + $0x94] ss:$8 sps:$4 sm:$0xff]   ;;  %277 = vmatprep.subr.bf16.mxu1 %v665_v4 }
  0x15   :  { %593 = vmatprep.subr.bf16.mxu0 %v736_v0  ;;  %278 = vmatpush1.bf16.msra.mxu1 %v667_v5  ;;  %v670_v8 = vld [vmem:[#allocation2 + $0x90] ss:$8 sps:$4 sm:$0xff]   ;;  %v671_v9 = vld [vmem:[#allocation2 + $0xa4] ss:$8 sps:$4 sm:$0xff]   ;;  %v661_v10 = vld [vmem:[#allocation2 + $0x40] ss:$8 sps:$4 sm:$0xff]  }
  0x16   :  { %279 = vmatprep.subr.bf16.mxu1 %v668_v7  ;;  %v673_v11 = vld [vmem:[#allocation2 + $0xa0] ss:$8 sps:$4 sm:$0xff]   ;;  %v662_v12 = vld [vmem:[#allocation2 + $0x50] ss:$8 sps:$4 sm:$0xff]   ;;  %v674_v13 = vld [vmem:[#allocation2 + $0xb4] ss:$8 sps:$4 sm:$0xff]  }
  0x17   :  { %v676_v14 = vld [vmem:[#allocation2 + $0xb0] ss:$8 sps:$4 sm:$0xff]   ;;  %v677_v15 = vld [vmem:[#allocation2 + $0xc4] ss:$8 sps:$4 sm:$0xff]   ;;  %v663_v16 = vld [vmem:[#allocation2 + $0x60] ss:$8 sps:$4 sm:$0xff]  }
  0x18   :  { %594 = vmatpush3.bf16.msra.mxu0 %v658_v2  ;;  %v679_v17 = vld [vmem:[#allocation2 + $0xc0] ss:$8 sps:$4 sm:$0xff]   ;;  %v680_v18 = vld [vmem:[#allocation2 + $0xd4] ss:$8 sps:$4 sm:$0xff]   ;;  %v664_v19 = vld [vmem:[#allocation2 + $0x70] ss:$8 sps:$4 sm:$0xff]  }
  0x19   :  { %595 = vmatprep.subr.bf16.mxu0 %v736_v0  ;;  %280 = vmatpush1.bf16.msra.mxu1 %v670_v8  ;;  %v778_v20 = vld [vmem:[%s821_s0] sm:$0xff]  ;;  %v682_v21 = vld [vmem:[#allocation2 + $0xd0] ss:$8 sps:$4 sm:$0xff]   ;;  %v686_v25 = vld [vmem:[#allocation2 + $0xf4] ss:$8 sps:$4 sm:$0xff]   ;;  %v738_v27 = vmov 0  }
  0x1a   :  { %281 = vmatprep.subr.bf16.mxu1 %v671_v9  ;;  %v94_v22 = vpack.c.bf16 %v778_v20, %v778_v20  ;;  %v683_v23 = vld [vmem:[#allocation2 + $0xe4] ss:$8 sps:$4 sm:$0xff]   ;;  %v685_v24 = vld [vmem:[#allocation2 + $0xe0] ss:$8 sps:$4 sm:$0xff]   ;;  %v688_v26 = vld [vmem:[#allocation2 + $0xf0] ss:$8 sps:$4 sm:$0xff]   ;;  %309 = vmatprep.mubr.bf16.mxu1 %v738_v27 }
  0x1b   :  { %v689_v28 = vld [vmem:[#allocation2 + $0x4] ss:$8 sps:$4 sm:$0xff]   ;;  %v690_v29 = vld [vmem:[#allocation2 + $0x14] ss:$8 sps:$4 sm:$0xff]   ;;  %v790_v31 = vshrl.u32 %v95_v30, 7 }
  0x1c   :  { %596 = vmatpush3.bf16.msra.mxu0 %v659_v3  ;;  %v91_v32 = vld [vmem:[#allocation2 + $0x180] sm:$0xff]  ;;  %v692_v44 = vld [vmem:[#allocation2 + $0x34] ss:$8 sps:$4 sm:$0xff]   ;;  %v698_v50 = vld [vmem:[#allocation2 + $0x110] ss:$8 sps:$4 sm:$0xff]  }
  0x1d   :  { %597 = vmatprep.subr.bf16.mxu0 %v736_v0  ;;  %282 = vmatpush1.bf16.msra.mxu1 %v673_v11  ;;  %v792_v33 = vunpack.c.l.bf16 %v91_v32  ;;  %v97_v34 = vsub.s32 0, %v790_v31  ;;  %v691_v43 = vld [vmem:[#allocation2 + $0x24] ss:$8 sps:$4 sm:$0xff]   ;;  %v694_v46 = vld [vmem:[#allocation2 + $0x54] ss:$8 sps:$4 sm:$0xff]   ;;  %v191_v55 = vsub.s32 1, %v790_v31  ;;  %v93_v56 = vunpack.c.h.bf16 %v91_v32 }
  0x1e   :  { %283 = vmatprep.subr.bf16.mxu1 %v674_v13  ;;  %v693_v45 = vld [vmem:[#allocation2 + $0x44] ss:$8 sps:$4 sm:$0xff]   ;;  %v696_v48 = vld [vmem:[#allocation2 + $0x74] ss:$8 sps:$4 sm:$0xff]   ;;  %v697_v49 = vld [vmem:[#allocation2 + $0x100] ss:$8 sps:$4 sm:$0xff]  }
  0x1f   :  { %v98_v35 = vrot.slane %v792_v33, %v97_v34  ;;  %v695_v47 = vld [vmem:[#allocation2 + $0x64] ss:$8 sps:$4 sm:$0xff]   ;;  %v699_v51 = vld [vmem:[#allocation2 + $0x120] ss:$8 sps:$4 sm:$0xff]   ;;  %v700_v52 = vld [vmem:[#allocation2 + $0x130] ss:$8 sps:$4 sm:$0xff]   ;;  %v196_v57 = vrot.slane %v93_v56, %v191_v55  ;;  %v192_v2 = vrot.slane %v792_v33, %v191_v55 }
  0x20   :  { %598 = vmatpush3.bf16.msra.mxu0 %v660_v6  ;;  %v701_v53 = vld [vmem:[#allocation2 + $0x140] ss:$8 sps:$4 sm:$0xff]   ;;  %v702_v54 = vld [vmem:[#allocation2 + $0x150] ss:$8 sps:$4 sm:$0xff]  }
  0x21   :  { %599 = vmatprep.subr.bf16.mxu0 %v736_v0  ;;  %284 = vmatpush1.bf16.msra.mxu1 %v676_v14  ;;  %v703_v8 = vld [vmem:[#allocation2 + $0x160] ss:$8 sps:$4 sm:$0xff]   ;;  %v704_v9 = vld [vmem:[#allocation2 + $0x170] ss:$8 sps:$4 sm:$0xff]  }
  0x22   :  { %285 = vmatprep.subr.bf16.mxu1 %v677_v15 }
  0x24   :  { %600 = vmatpush3.bf16.msra.mxu0 %v661_v10  ;;  %v326_v10 = vsub.s32 2, %v790_v31 }
  0x25   :  { %601 = vmatprep.subr.bf16.mxu0 %v736_v0  ;;  %286 = vmatpush1.bf16.msra.mxu1 %v679_v17 }
  0x26   :  { %287 = vmatprep.subr.bf16.mxu1 %v680_v18  ;;  %v327_v11 = vrot.slane %v792_v33, %v326_v10 }
  0x28   :  { %602 = vmatpush3.bf16.msra.mxu0 %v662_v12 }
  0x29   :  { %603 = vmatprep.subr.bf16.mxu0 %v736_v0  ;;  %288 = vmatpush1.bf16.msra.mxu1 %v682_v21 }
  0x2a   :  { %289 = vmatprep.subr.bf16.mxu1 %v683_v23 }
  0x2c   :  { %604 = vmatpush3.bf16.msra.mxu0 %v663_v16 }
  0x2d   :  { %605 = vmatprep.subr.bf16.mxu0 %v736_v0  ;;  %290 = vmatpush1.bf16.msra.mxu1 %v685_v24 }
  0x2e   :  { %291 = vmatprep.subr.bf16.mxu1 %v686_v25 }
  0x30   :  { %606 = vmatpush3.bf16.msra.mxu0 %v664_v19  ;;  %v420_v19 = vsub.s32 3, %v790_v31 }
  0x31   :  { %611 = vmatprep.subr.bf16.mxu0 %v736_v0  ;;  %292 = vmatpush1.bf16.msra.mxu1 %v688_v26  ;;  %v515_v26 = vand.u32 127, %v95_v30 }
  0x32   :  { %631 = vmatprep.subr.bf16.mxu1 %v736_v0 }
  0x33   :  { %608 = vmatmul.mubr.bf16.vlgmr.msra.gmra.mrb[0].mxu0 %v94_v22  ;;  %vm516_vm1 = vcmp.lt.s32.totalorder %v515_v26, 48 }
  0x34   :  { %627 = vmatprep.mubr.msk.bf16.mxu0 %vm737_vm0, %v736_v0  ;;  %612 = vmatpush3.bf16.msra.mxu0 %v689_v28 }
  0x35   :  { %613 = vmatprep.subr.bf16.mxu0 %v736_v0 }
  0x38   :  { %614 = vmatpush3.bf16.msra.mxu0 %v690_v29 }
  0x39   :  { %615 = vmatprep.subr.bf16.mxu0 %v736_v0 }
  0x3c   :  { %616 = vmatpush3.bf16.msra.mxu0 %v691_v43 }
  0x3d   :  { %617 = vmatprep.subr.bf16.mxu0 %v736_v0 }
  0x40   :  { %618 = vmatpush3.bf16.msra.mxu0 %v692_v44 }
  0x41   :  { %619 = vmatprep.subr.bf16.mxu0 %v736_v0 }
  0x44   :  { %620 = vmatpush3.bf16.msra.mxu0 %v693_v45 }
  0x45   :  { %621 = vmatprep.subr.bf16.mxu0 %v736_v0 }
  0x48   :  { %622 = vmatpush3.bf16.msra.mxu0 %v694_v46 }
  0x49   :  { %623 = vmatprep.subr.bf16.mxu0 %v736_v0 }
  0x4c   :  { %624 = vmatpush3.bf16.msra.mxu0 %v695_v47 }
  0x4d   :  { %625 = vmatprep.subr.bf16.mxu0 %v736_v0 }
  0x50   :  { %626 = vmatpush3.bf16.msra.mxu0 %v696_v48 }
 0x106   :  { %v181_v36 = vpop.f32.mrb[0].mxu0 }
 0x107   :  { %v182_v37 = vadd.f32 %v181_v36, %v98_v35  ;;  %v609_v38 = vpop.f32.mrb[1].mxu0 }
 0x108   :  { %v184_v39 = vpop.f32.mrb[2].mxu0 }
 0x109   :  { %v187_v40 = vmax.f32 %v182_v37, 0.0  ;;  %v610_v41 = vpop.f32.mrb[3].mxu0 }
 0x10b   :  { %v188_v42 = vpack.c.bf16 %v187_v40, %v187_v40 }
 0x10d   :  { %310 = vmatmul.mubr.bf16.vlgmr.msra.gmra.mrb[0].mxu1 %v188_v42 }
 0x10e   :  { %647 = vmatprep.mubr.msk.bf16.mxu1 %vm737_vm0, %v736_v0  ;;  %632 = vmatpush3.bf16.msra.mxu1 %v697_v49 }
 0x10f   :  { %633 = vmatprep.subr.bf16.mxu1 %v736_v0 }
 0x112   :  { %634 = vmatpush3.bf16.msra.mxu1 %v698_v50 }
 0x113   :  { %635 = vmatprep.subr.bf16.mxu1 %v736_v0 }
 0x116   :  { %636 = vmatpush3.bf16.msra.mxu1 %v699_v51 }
 0x117   :  { %637 = vmatprep.subr.bf16.mxu1 %v736_v0 }
 0x11a   :  { %638 = vmatpush3.bf16.msra.mxu1 %v700_v52 }
 0x11b   :  { %639 = vmatprep.subr.bf16.mxu1 %v736_v0 }
 0x11e   :  { %640 = vmatpush3.bf16.msra.mxu1 %v701_v53 }
 0x11f   :  { %641 = vmatprep.subr.bf16.mxu1 %v736_v0 }
 0x122   :  { %642 = vmatpush3.bf16.msra.mxu1 %v702_v54 }
 0x123   :  { %643 = vmatprep.subr.bf16.mxu1 %v736_v0 }
 0x126   :  { %644 = vmatpush3.bf16.msra.mxu1 %v703_v8 }
 0x127   :  { %645 = vmatprep.subr.bf16.mxu1 %v736_v0 }
 0x12a   :  { %646 = vmatpush3.bf16.msra.mxu1 %v704_v9 }
 0x1e0   :  { %v311_v58 = vpop.f32.mrb[0].mxu1 }
 0x1e1   :  { %v313_v59 = vpop.f32.mrb[1].mxu1  ;;  %v312_v4 = vadd.f32 %v311_v58, %v192_v2 }
 0x1e2   :  { %v314_v60 = vadd.f32 %v313_v59, %v196_v57  ;;  %v315_v61 = vpop.f32.mrb[2].mxu1 }
 0x1e3   :  { %v316_v62 = vpop.f32.mrb[3].mxu1 }
 0x1e4   :  { %v318_v63 = vmul.f32 0.5, %v314_v60 }
 0x1e6   :  { %v319_v1 = vmul.f32 1.442695, %v318_v63 }
 0x1e8   :  { %705 = vpow2.f32 %v319_v1 }
 0x1f2   :  { %v706_v3 = vpop.eup %705 }
 0x1f3   :  { %v321_v5 = vmul.f32 %v706_v3, %v778_v20  ;;  %v421_v20 = vrot.slane %v792_v33, %v420_v19 }
 0x1f5   :  { %v322_v6 = vadd.f32 %v321_v5, %v312_v4 }
 0x1f7   :  { %v323_v7 = vpack.c.bf16 %v322_v6, %v322_v6 }
 0x1f9   :  { %628 = vmatmul.mubr.bf16.vlgmr.msra.gmra.mrb[4].mxu0 %v323_v7 }
 0x2cc   :  { %v410_v12 = vpop.f32.mrb[4].mxu0 }
 0x2cd   :  { %v411_v13 = vadd.f32 %v410_v12, %v327_v11  ;;  %v629_v14 = vpop.f32.mrb[5].mxu0 }
 0x2ce   :  { %v413_v15 = vpop.f32.mrb[6].mxu0 }
 0x2cf   :  { %v416_v16 = vmax.f32 %v411_v13, 0.0  ;;  %v630_v17 = vpop.f32.mrb[7].mxu0 }
 0x2d1   :  { %v417_v18 = vpack.c.bf16 %v416_v16, %v416_v16 }
 0x2d3   :  { %648 = vmatmul.mubr.bf16.vlgmr.msra.gmra.mrb[4].mxu1 %v417_v18 }
 0x3a6   :  { %v504_v21 = vpop.f32.mrb[4].mxu1 }
 0x3a7   :  { %v505_v0 = vadd.f32 %v504_v21, %v421_v20  ;;  %v649_v22 = vpop.f32.mrb[5].mxu1 }
 0x3a8   :  { %v507_v23 = vpop.f32.mrb[6].mxu1 }
 0x3a9   :  { %v510_v24 = vmul.f32 0.5, %v505_v0  ;;  %v650_v25 = vpop.f32.mrb[7].mxu1 }
 0x3ab   :  { %707 = vtanh.f32 %v510_v24 }
 0x3b5   :  { %v708_v27 = vpop.eup %707 }
 0x3b6   :  { %v512_v28 = vmul.f32 0.5, %v708_v27 }
 0x3b8   :  { %v513_v29 = vadd.f32 0.5, %v512_v28 }
 0x3ba   :  { %v517_v32 = vsel %vm516_vm1, %v513_v29, %v322_v6 }
 0x3bb   :  { %518 = vst [vmem:[%s823_s2] sm:$0xff] %v517_v32 }
 0x3bc   :  { %523 = vsyncpa [#allocation3], 1 }

</bundles_post_ra>
